<compile_context>
chip_gen: v7x
topology: tpu7x:2x2x1
jax: 0.10.0
libtpu: 0.0.40
codegen_flags: <defaults>
</compile_context>

<pallas_src>
import functools

import jax
import jax.numpy as jnp
import numpy as np
from jax.experimental import pallas as pl
from jax.experimental.pallas import tpu as pltpu

# Problem sizes (consistent with the module: X is n x q x d, w_options is r x w).
N, Q, D = 256, 4, 8      # 256 candidate points (raw-sample batch), q=4, d=8
W_DIM, R = 4, 3          # w_options: r x w
O = 2                    # surrogate model outputs
S = 3                    # num_mc_samples (inner MC samples)
F = 2                    # number of fantasy models (outer samples)
BEST_F = 0.1             # utility threshold
LANE_TILE = 128          # candidate points per grid step (lane axis)


def _softplus(x):
    # numerically-safe softplus; exp/log1p go to the EUP slot
    return jnp.log1p(jnp.exp(-jnp.abs(x))) + jnp.maximum(x, 0.0)


def _round_up(x, m):
    return ((x + m - 1) // m) * m


def fantasy_mc_kernel(bf_ref, xz_ref, w_ref, out_ref, *,
                      n_models, n_outputs, n_w_opts, n_q, z_rows, x_rows):
    """One grid step = LANE_TILE candidate points (lanes).

    xz_ref : (z_rows + x_rows, TN)  rows 0:z_rows  = mean_s(Z), tiled per (o,m,q)
                                    rows z_rows:   = X features (q-blocked) + ones + pad
    w_ref  : ((1+R)*F*O*Q, x_rows)  fused block-diagonal weights; rows 0:FOQ are the
                                    mean head (r-summed, biases folded), rows FOQ: are
                                    the R pre-softplus std heads (per-r biases folded)
    bf_ref : (1, 1) SMEM scalar best_f
    out_ref: (1, TN) acquisition values for this tile's points
    """
    nf, no, nr, nq = n_models, n_outputs, n_w_opts, n_q
    foq = nf * no * nq            # rows per head group (o-major, then m, then q)
    fq = nf * nq                  # rows per output group (m-major, then q)

    z = xz_ref[0:z_rows, :]                        # (FOQ, TN)
    x = xz_ref[z_rows:z_rows + x_rows, :]          # (x_rows, TN)

    # Single fused MXU dot: mean head + all R std heads, all models/outputs/q.
    #   ((1+R)*FOQ, x_rows) @ (x_rows, TN) -> ((1+R)*FOQ, TN)
    xw = jnp.dot(w_ref[...], x, preferred_element_type=jnp.float32)

    # mean head already equals sum_r (mean_x + w_mean_r + b_mean)  (R-sum folded)
    mean_part = xw[0:foq, :]                       # (FOQ, TN)

    # ONE softplus over the R stacked std heads (sublane-stacked, no lane concat).
    sp = _softplus(xw[foq:(1 + nr) * foq, :])      # (R*FOQ, TN)
    std_sum = sp[0:foq, :]
    for r in range(1, nr):                         # aligned sublane slices
        std_sum = std_sum + sp[r * foq:(r + 1) * foq, :]

    # reparameterized samples, already averaged over the inner MC axis
    total = mean_part + std_sum * z                # (FOQ, TN)

    # aggregation = Mean over (outputs o, w options r); o is the outermost row group
    val = total[0:fq, :]
    for o in range(1, no):
        val = val + total[o * fq:(o + 1) * fq, :]
    val = val * (1.0 / (nr * no))                  # (F*Q, TN), rows = m*Q + q

    # utility relu(x - best_f); best_f is a runtime SMEM scalar (VPU broadcast)
    util = jnp.maximum(val - bf_ref[0, 0], 0.0)

    # q_reduction = amax over q (sublane reduce per model), then mean over models
    acc = jnp.zeros((1, util.shape[1]), jnp.float32)
    for m in range(nf):
        acc = acc + jnp.max(util[m * nq:(m + 1) * nq, :], axis=0, keepdims=True)
    out_ref[...] = acc * (1.0 / nf)                # lane-dense (1, TN) store


def fantasy_mc_acqf(X, w_options, Z, params, best_f=BEST_F):
    """X: (N, Q, D); w_options: (R, W); Z: (S, N, Q, O) base samples -> (N,) values."""
    A_x, A_w, b_mean, B_x, B_w, b_std = params
    f32 = jnp.float32
    n_models, d, n_out = A_x.shape
    n, q, _ = X.shape
    n_r, _ = w_options.shape

    fq = n_models * q
    foq = n_models * n_out * q
    qd = q * d
    x_rows = _round_up(qd + 1, 8)                  # design rows + ones row, 8-aligned
    z_rows = foq
    tn = LANE_TILE
    n_pad = _round_up(n, tn)

    # ---------- X-independent parameter packing (hoisted out of the kernel) ----------
    # mean head: sum_r (x @ A_x + w_r @ A_w + b_mean)  -> fold R-scale + r-summed bias
    w_mean_sum = jnp.einsum('rw,mwo->mo', w_options.astype(f32), A_w.astype(f32)) \
        + n_r * b_mean.astype(f32)[:, 0, :]                                 # (F, O)
    # std heads: per-r pre-softplus offsets
    w_std_c = jnp.einsum('rw,mwo->mro', w_options.astype(f32), B_w.astype(f32)) \
        + b_std.astype(f32)[:, None, 0, :]                                  # (F, R, O)

    eye_q = jnp.eye(q, dtype=f32)
    # block-diagonal in q so the single dot produces (head, o, m, q) rows with n on lanes
    mean_blk = n_r * jnp.einsum('mdo,qp->omqpd', A_x.astype(f32), eye_q)    # (O,F,Q,Q,D)
    mean_rows = mean_blk.reshape(foq, qd)
    mean_ones = jnp.broadcast_to(w_mean_sum.T[:, :, None],
                                 (n_out, n_models, q)).reshape(foq, 1)

    std_blk = jnp.einsum('mdo,qp->omqpd', B_x.astype(f32), eye_q)           # (O,F,Q,Q,D)
    std_rows1 = std_blk.reshape(foq, qd)
    std_rows = jnp.tile(std_rows1[None], (n_r, 1, 1)).reshape(n_r * foq, qd)
    std_ones = jnp.broadcast_to(jnp.transpose(w_std_c, (1, 2, 0))[..., None],
                                (n_r, n_out, n_models, q)).reshape(n_r * foq, 1)

    w_raw = jnp.concatenate(
        [jnp.concatenate([mean_rows, mean_ones], axis=1),
         jnp.concatenate([std_rows, std_ones], axis=1)], axis=0)            # ((1+R)*FOQ, QD+1)
    w_rows = (1 + n_r) * foq
    wbig = jnp.zeros((w_rows, x_rows), f32).at[:, :qd + 1].set(w_raw)

    # ---------- per-call data layout: n on lanes, everything else on sublanes ----------
    xt = jnp.transpose(X.astype(f32), (1, 2, 0)).reshape(qd, n)             # row = q*D + d
    x_aug = jnp.concatenate(
        [xt, jnp.ones((1, n), f32), jnp.zeros((x_rows - qd - 1, n), f32)], axis=0)
    zbar = jnp.transpose(Z.astype(f32).mean(axis=0), (2, 1, 0))             # (O, Q, N)
    zt = jnp.broadcast_to(zbar[:, None, :, :],
                          (n_out, n_models, q, n)).reshape(foq, n)
    xz = jnp.concatenate([zt, x_aug], axis=0)                               # (z_rows+x_rows, N)
    if n_pad != n:
        xz = jnp.pad(xz, ((0, 0), (0, n_pad - n)))

    best_f_arr = jnp.full((1, 1), best_f, dtype=f32)                        # runtime scalar

    kernel = functools.partial(
        fantasy_mc_kernel, n_models=n_models, n_outputs=n_out,
        n_w_opts=n_r, n_q=q, z_rows=z_rows, x_rows=x_rows)

    out = pl.pallas_call(
        kernel,
        out_shape=jax.ShapeDtypeStruct((1, n_pad), jnp.float32),
        grid=(n_pad // tn,),
        in_specs=[
            pl.BlockSpec((1, 1), lambda i: (0, 0),
                         memory_space=pltpu.MemorySpace.SMEM),   # best_f scalar
            pl.BlockSpec((z_rows + x_rows, tn), lambda i: (0, i)),  # fused z|x slab
            pl.BlockSpec((w_rows, x_rows), lambda i: (0, 0)),       # constant weights
        ],
        out_specs=pl.BlockSpec((1, tn), lambda i: (0, i)),
        compiler_params=pltpu.CompilerParams(
            dimension_semantics=("parallel",)),                 # v7x: shard over 2 TCs
    )(best_f_arr, xz, wbig)
    return out[0, :n]


def reference(X, w_options, Z, params, best_f=BEST_F):
    """Pure-JAX reference mirroring the torch forward pass literally."""
    A_x, A_w, b_mean, B_x, B_w, b_std = params
    mean_x = jnp.einsum('nqd,mdo->mnqo', X, A_x)                   # (F,N,Q,O)
    std_x = jnp.einsum('nqd,mdo->mnqo', X, B_x)
    w_mean = jnp.einsum('rw,mwo->mro', w_options, A_w) + b_mean    # (F,R,O)
    w_std = jnp.einsum('rw,mwo->mro', w_options, B_w) + b_std
    mean = mean_x[:, None] + w_mean[:, :, None, None, :]           # (F,R,N,Q,O)
    std = _softplus(std_x[:, None] + w_std[:, :, None, None, :])
    samples = (mean[:, None] + std[:, None] * Z[None, :, None]).transpose(0, 1, 3, 4, 5, 2)
    agg = samples.mean(axis=(-1, -2))            # Mean aggregation over (o, r): (F,S,N,Q)
    red = agg.mean(axis=1)                       # sample_reduction over dim=1:   (F,N,Q)
    util = jnp.maximum(red - best_f, 0.0)        # utility
    qmax = util.max(axis=-1)                     # q_reduction (amax over q):     (F,N)
    return qmax.mean(axis=0)                     # sample_reduction over dim=0:   (N,)


if __name__ == "__main__":
    key = jax.random.PRNGKey(0)
    ks = jax.random.split(key, 10)

    X = jax.random.normal(ks[0], (N, Q, D), dtype=jnp.float32)            # n x q x d
    w_options = jax.random.normal(ks[1], (R, W_DIM), dtype=jnp.float32)   # r x w
    Z = jax.random.normal(ks[2], (S, N, Q, O), dtype=jnp.float32)         # base samples

    # Deterministic synthetic fantasy-model parameters (F linear-Gaussian surrogates).
    params = (
        0.3 * jax.random.normal(ks[3], (F, D, O), dtype=jnp.float32),      # A_x
        0.3 * jax.random.normal(ks[4], (F, W_DIM, O), dtype=jnp.float32),  # A_w
        0.1 * jax.random.normal(ks[5], (F, 1, O), dtype=jnp.float32),      # b_mean
        0.2 * jax.random.normal(ks[6], (F, D, O), dtype=jnp.float32),      # B_x
        0.2 * jax.random.normal(ks[7], (F, W_DIM, O), dtype=jnp.float32),  # B_w
        0.1 * jax.random.normal(ks[8], (F, 1, O), dtype=jnp.float32),      # b_std
    )

    out = fantasy_mc_acqf(X, w_options, Z, params)
    out = jax.block_until_ready(out)

    ref = reference(X, w_options, Z, params)
    np.testing.assert_allclose(np.asarray(out), np.asarray(ref),
                               rtol=1e-4, atol=1e-5)
    assert out.shape == (N,)
    print("KERNEL_OK")
</pallas_src>

<mosaic_0001>
module attributes {stable_mosaic.version = 11 : i64} {
  func.func @fantasy_mc_kernel(%arg0: i32, %arg1: memref<1x1xf32, #tpu.memory_space<smem>>, %arg2: memref<56x128xf32, #tpu.memory_space<vmem>>, %arg3: memref<64x40xf32, #tpu.memory_space<vmem>>, %arg4: memref<1x128xf32, #tpu.memory_space<vmem>>) attributes {dimension_semantics = [#tpu.dimension_semantics<parallel>], iteration_bounds = array<i64: 2>, scalar_prefetch = 0 : i64, scratch_operands = 0 : i64, tpu.core_type = #tpu.core_type<tc>, window_params = [{transform_indices = @transform_0, window_bounds = array<i64: 1, 1>}, {transform_indices = @transform_1, window_bounds = array<i64: 56, 128>}, {pipeline_mode = #tpu.pipeline_mode<synchronous>, transform_indices = @transform_2, window_bounds = array<i64: 64, 40>}, {transform_indices = @transform_3, window_bounds = array<i64: 1, 128>}]} {
    %c0 = arith.constant 0 : index
    %c0_0 = arith.constant 0 : index
    %0 = vector.load %arg2[%c0, %c0_0] : memref<56x128xf32, #tpu.memory_space<vmem>>, vector<16x128xf32>
    %c16 = arith.constant 16 : index
    %c0_1 = arith.constant 0 : index
    %1 = vector.load %arg2[%c16, %c0_1] : memref<56x128xf32, #tpu.memory_space<vmem>>, vector<40x128xf32>
    %c0_2 = arith.constant 0 : index
    %c0_3 = arith.constant 0 : index
    %2 = vector.load %arg3[%c0_2, %c0_3] : memref<64x40xf32, #tpu.memory_space<vmem>>, vector<64x40xf32>
    %cst = arith.constant dense<0.000000e+00> : vector<64x128xf32>
    %3 = tpu.matmul %2, %1, %cst {dimension_numbers = #tpu.dot_dimension_numbers<[1], [0], [0], [1], [0, 0, 1, 1], [], []>} : vector<64x40xf32>, vector<40x128xf32>, vector<64x128xf32> -> vector<64x128xf32>
    %4 = vector.extract_strided_slice %3 {offsets = [0, 0], sizes = [16, 128], strides = [1, 1]} : vector<64x128xf32> to vector<16x128xf32>
    %5 = vector.extract_strided_slice %3 {offsets = [16, 0], sizes = [48, 128], strides = [1, 1]} : vector<64x128xf32> to vector<48x128xf32>
    %6 = math.absf %5 : vector<48x128xf32>
    %cst_4 = arith.constant 0.000000e+00 : f32
    %7 = vector.broadcast %cst_4 : f32 to vector<48x128xf32>
    %8 = arith.subf %7, %6 : vector<48x128xf32>
    %9 = math.exp %8 : vector<48x128xf32>
    %10 = math.log1p %9 : vector<48x128xf32>
    %cst_5 = arith.constant 0.000000e+00 : f32
    %11 = vector.broadcast %cst_5 : f32 to vector<48x128xf32>
    %12 = arith.maximumf %5, %11 : vector<48x128xf32>
    %13 = arith.addf %10, %12 : vector<48x128xf32>
    %14 = vector.extract_strided_slice %13 {offsets = [0, 0], sizes = [16, 128], strides = [1, 1]} : vector<48x128xf32> to vector<16x128xf32>
    %15 = vector.extract_strided_slice %13 {offsets = [16, 0], sizes = [16, 128], strides = [1, 1]} : vector<48x128xf32> to vector<16x128xf32>
    %16 = arith.addf %14, %15 : vector<16x128xf32>
    %17 = vector.extract_strided_slice %13 {offsets = [32, 0], sizes = [16, 128], strides = [1, 1]} : vector<48x128xf32> to vector<16x128xf32>
    %18 = arith.addf %16, %17 : vector<16x128xf32>
    %19 = arith.mulf %18, %0 : vector<16x128xf32>
    %20 = arith.addf %4, %19 : vector<16x128xf32>
    %21 = vector.extract_strided_slice %20 {offsets = [0, 0], sizes = [8, 128], strides = [1, 1]} : vector<16x128xf32> to vector<8x128xf32>
    %22 = vector.extract_strided_slice %20 {offsets = [8, 0], sizes = [8, 128], strides = [1, 1]} : vector<16x128xf32> to vector<8x128xf32>
    %23 = arith.addf %21, %22 : vector<8x128xf32>
    %cst_6 = arith.constant 0.166666672 : f32
    %24 = vector.broadcast %cst_6 : f32 to vector<8x128xf32>
    %25 = arith.mulf %23, %24 : vector<8x128xf32>
    %c0_7 = arith.constant 0 : index
    %c0_8 = arith.constant 0 : index
    %26 = memref.load %arg1[%c0_7, %c0_8] : memref<1x1xf32, #tpu.memory_space<smem>>
    %27 = vector.broadcast %26 : f32 to vector<8x128xf32>
    %28 = arith.subf %25, %27 : vector<8x128xf32>
    %cst_9 = arith.constant 0.000000e+00 : f32
    %29 = vector.broadcast %cst_9 : f32 to vector<8x128xf32>
    %30 = arith.maximumf %28, %29 : vector<8x128xf32>
    %cst_10 = arith.constant 0.000000e+00 : f32
    %31 = vector.broadcast %cst_10 : f32 to vector<1x128xf32>
    %32 = vector.extract_strided_slice %30 {offsets = [0, 0], sizes = [4, 128], strides = [1, 1]} : vector<8x128xf32> to vector<4x128xf32>
    %cst_11 = arith.constant dense<0xFF800000> : vector<128xf32>
    %33 = vector.multi_reduction <maximumf>, %32, %cst_11 [0] : vector<4x128xf32> to vector<128xf32>
    %34 = vector.shape_cast %33 : vector<128xf32> to vector<1x128xf32>
    %35 = arith.addf %31, %34 : vector<1x128xf32>
    %36 = vector.extract_strided_slice %30 {offsets = [4, 0], sizes = [4, 128], strides = [1, 1]} : vector<8x128xf32> to vector<4x128xf32>
    %cst_12 = arith.constant dense<0xFF800000> : vector<128xf32>
    %37 = vector.multi_reduction <maximumf>, %36, %cst_12 [0] : vector<4x128xf32> to vector<128xf32>
    %38 = vector.shape_cast %37 : vector<128xf32> to vector<1x128xf32>
    %39 = arith.addf %35, %38 : vector<1x128xf32>
    %cst_13 = arith.constant 5.000000e-01 : f32
    %40 = vector.broadcast %cst_13 : f32 to vector<1x128xf32>
    %41 = arith.mulf %39, %40 : vector<1x128xf32>
    %c0_14 = arith.constant 0 : index
    %c0_15 = arith.constant 0 : index
    %42 = vector.load %arg4[%c0_14, %c0_15] : memref<1x128xf32, #tpu.memory_space<vmem>>, vector<1x128xf32>
    tpu.vector_store %arg4[%c0_14, %c0_15], %41 {strides = array<i32>} : memref<1x128xf32, #tpu.memory_space<vmem>>, vector<1x128xf32>,
    return
  }
  func.func @transform_0(%arg0: i32) -> (i32, i32) {
    %c0_i32 = arith.constant 0 : i32
    %c0_i32_0 = arith.constant 0 : i32
    %c0_i32_1 = arith.constant 0 : i32
    return %c0_i32, %c0_i32_0 : i32, i32
  }
  func.func @transform_1(%arg0: i32) -> (i32, i32) {
    %c0_i32 = arith.constant 0 : i32
    %c0_i32_0 = arith.constant 0 : i32
    return %c0_i32, %arg0 : i32, i32
  }
  func.func @transform_2(%arg0: i32) -> (i32, i32) {
    %c0_i32 = arith.constant 0 : i32
    %c0_i32_0 = arith.constant 0 : i32
    %c0_i32_1 = arith.constant 0 : i32
    return %c0_i32, %c0_i32_0 : i32, i32
  }
  func.func @transform_3(%arg0: i32) -> (i32, i32) {
    %c0_i32 = arith.constant 0 : i32
    %c0_i32_0 = arith.constant 0 : i32
    return %c0_i32, %arg0 : i32, i32
  }
}

</mosaic_0001>

<bundles_post_ra>
// kernel: tpu_custom_call.1
= control target key start
LH: loop header
LB: loop body
LE: loop exit
PB: predicated region body
PF: predicated region fallthrough
CT: control target
= control target key end

     0   :  { %s1048_s0 = inlined_call_operand.<no memory space> [shape: f32[1,1], index: 0, kind: input, shape index: {}]   ;;  %s1049_s1 = inlined_call_operand.hbm [shape: f32[56,256], index: 1, kind: input, shape index: {}]   ;;  %s1050_s2 = inlined_call_operand.vmem [shape: f32[64,40], index: 2, kind: input, shape index: {}]   ;;  %s1051_s3 = inlined_call_operand.hbm [shape: f32[1,256], index: 3, kind: output, shape index: {}]  }
   0x1   :  { %8 = sst [smem:[#allocation2]] %s1048_s0 }
   0x2   :  { %9 = vsyncpa [#allocation4], 0 }
   0x3   :  { %11 = vsyncpa [#allocation4 + $0x1], 0 }
   0x4   :  { %12 = vsyncpa [#allocation5], 0 }
   0x5   :  { %14 = vsyncpa [#allocation5 + $0x1], 0  ;;  %s802_s14 = smov 0   ;;  %s804_s15 = smov 0  }
   0x6   :  { %s806_s16 = smov 0   ;;  %s808_s17 = smov 0  }
   0x7 LB: > { %s823_s0 = sadd.s32 4294967295, %s772_s17   ;;  %s536_s18 = sadd.s32 4294967294, %s772_s17   ;;  %s772_s17 = sphi %s808_s17, %s1070_s17   ;;  %s768_s16 = sphi %s806_s16, %s1069_s16   ;;  %s764_s15 = sphi %s804_s15, %s1068_s15   ;;  %s760_s14 = sphi %s802_s14, %s1067_s14  }
   0x8   : > { %s827_s19 = sadd.s32 1, %s772_s17   ;;  %s48_s20 = sadd.s32 1, %s768_s16 }
   0x9   : > { %s45_s21 = ssub.s32 %s772_s17, %s827_s19  ;;  %p55_p0 = scmp.ne.s32.totalorder %s768_s16, %s764_s15 }
   0xa   : > { %p46_p1 = scmp.eq.s32.totalorder %s45_s21, 0  ;;  %p56_p2 = scmp.eq.s32.totalorder %s772_s17, 0 }
   0xb   : > { %p61_p3 = scmp.ne.s32.totalorder %s764_s15, %s760_s14  ;;  %p62_p4 = scmp.eq.s32.totalorder %s823_s0, 0 }
   0xc   : > { %s839_s22 = scalar_select %p46_p1, %s768_s16, %s48_s20  }
   0xd   : > { %p57_p5 = por %p56_p2, %p55_p0  ;;  %p841_p6 = por %p62_p4, %p61_p3 }
   0xe   : > { %p106_p7 = scmp.eq.s32.totalorder %s823_s0, 1  ;;  %p112_p8 = scmp.eq.s32.totalorder %s536_s18, 1 }
   0xf   : > { %p615_p10 = scmp.lt.s32.totalorder %s772_s17, 2  ;;  %s138_s26 = sand.u32 1, %s768_s16  }
  0x10   : > { %p848_p11 = por %p106_p7, %p55_p0  ;;  %p852_p12 = por %p112_p8, %p61_p3 }
  0x11   : > { %s539_s27 = sshll.u32 %s772_s17, 7  ;;  %s601_s28 = smul.u32 56, %s138_s26 }
  0x12   : > { %s1054_s24 = scalar_select %p848_p11, 1, 0 }
  0x13   : > { %s1055_s25 = scalar_select %p852_p12, 1, 0 }
  0x14   : > { %s861_s4 = scalar_lea.hbm %s1049_s1, %s539_s27  ;;  %p863_p13 = pnand %p615_p10, %p57_p5 }
  0x15   : > { %s142_s6 = scalar_lea.vmem [#allocation3], %s601_s28  ;;  %s870_s8 = scalar_lea.sflag [#allocation4], %s138_s26 }
  0x16   : > { %s148_s7 = sshll.u32 %s142_s6, 4  ;;  %s676_s9 = scalar_lea.hbm %s861_s4, 896  ;;  %s867_s7 = int_to_ptr.vmem [resolvable:$true] %s148_s7 }
  0x17   : > { %p677_p1 = scmp.ne.s32.totalorder %s861_s4, %s676_s9  ;;  %p678_p2 = pneg %p863_p13 }
  0x18   : > { %s681_s12 = scalar_lea.hbm %s1049_s1, 1792  ;;  %p682_p5 = scmp.lt.u32.totalorder %s861_s4, %s1049_s1 }
  0x19   : > { %p679_p3 = pnand %p678_p2, %p677_p1  ;;  %p683_p7 = scmp.lt.u32.totalorder %s681_s12, %s676_s9 }
  0x1a   : > { %p685_p10 = scmp.lt.u32.totalorder %s676_s9, %s861_s4 }
  0x1b   : > { %p680_p4 = pneg %p679_p3  ;;  %p684_p8 = por %p683_p7, %p682_p5 }
  0x1d   : > { %p686_p9 = por %p685_p10, %p684_p8 }
  0x1f   : > { %p687_p0 = pnand %p686_p9, %p680_p4 }
  0x21   : > { %690 = shalt.err (!%p687_p0)
}
  0x22   : > { %s691_s20 = scalar_lea.vmem %s867_s7, 896  ;;  %s774_s21 = smov [#allocation3]  }
  0x23   : > { %p692_p1 = scmp.ne.s32.totalorder %s867_s7, %s691_s20  ;;  %s696_s26 = sshll.u32 %s774_s21, 4  ;;  %s697_s26 = int_to_ptr.vmem [resolvable:$false] %s696_s26 }
  0x24   : > { %s698_s27 = scalar_lea.vmem %s697_s26, 1792  ;;  %p699_p11 = scmp.lt.s32.totalorder %s867_s7, %s697_s26 }
  0x25   : > { %p694_p3 = pnand %p692_p1, %p678_p2  ;;  %p700_p5 = scmp.lt.s32.totalorder %s698_s27, %s691_s20 }
  0x27   : > { %p695_p12 = pneg %p694_p3  ;;  %p701_p7 = por %p700_p5, %p699_p11 }
  0x29   : > { %p702_p8 = pnand %p701_p7, %p695_p12 }
  0x2b   : > { %705 = shalt.err (!%p702_p8)
}
  0x2c   : > { %s775_s28 = smov 256   ;;  %s776_s29 = smov 128  }
  0x2d   : > { %s777_s30 = smov 8   ;;  %p156_p9 = scmp.lt.s32.totalorder %s772_s17, 3 }
  0x2e   : > { %610 = dma.hbm_to_vmem [thread:$0]  (!%p863_p13), %s861_s4, 896, %s867_s7, %s870_s8, %s775_s28, %s776_s29, %s777_s30  }
  0x2f   : > { %p1057_p0 = scmp.ge.s32.totalorder %s772_s17, 1 }
  0x31   : > { %p157_p2 = pnand %p1057_p0, %p156_p9 }
  0x32   : > { %s902_s6 = sand.u32 (!%p157_p2), 1, %s764_s15  }
  0x33   : > { %160 = sbr.rel (%p157_p2) target bundleno = 372 (0x174), region = 32  ;;  %s163_s10 = scalar_lea.sflag (!%p157_p2), [#allocation4], %s902_s6 }
  0x34   : > { %s602_s9 = smul.u32 (!%p157_p2), 56, %s902_s6 }
  0x36   : > { %s906_s11 = scalar_lea.vmem (!%p157_p2), [#allocation3], %s602_s9 }
  0x3a   : > { %751 = dma.done.wait (%p841_p6), %s163_s10, 896  }
  0x3b   : > { %753 = vsyncadd (%p841_p6), %s163_s10, 4294966400  ;;  %vm203_vm0 = vcmask 326656   ;;  %v190_v0 = vld [vmem:[%s906_s11 + $0x10] sm:$0xff]  ;;  %v191_v1 = vld [vmem:[%s906_s11 + $0x18] sm:$0xff]  ;;  %s433_s10 = sld [smem:[#allocation2]]  ;;  %vm437_vm7 = vcmask 1043456  }
  0x3c   : > { %v192_v2 = vld [vmem:[%s906_s11 + $0x20] sm:$0xff]  ;;  %v587_v3 = vpack.c.bf16 %v191_v1, %v190_v0  ;;  %v193_v4 = vld [vmem:[%s906_s11 + $0x28] sm:$0xff]  ;;  %v194_v8 = vld [vmem:[%s906_s11 + $0x30] sm:$0xff]  ;;  %vm446_vm8 = vcmask 1047556   ;;  %s187_s4 = scalar_lea.vmem [#allocation6], %s902_s6  ;;  %s458_s12 = scalar_lea.sflag [#allocation5], %s902_s6 }
  0x3d   : > { %v195_v5 = vld [vmem:[%s1050_s2] sm:$0xff]  ;;  %v591_v6 = vpack.c.bf16 %v193_v4, %v192_v2  ;;  %v196_v9 = vld [vmem:[%s1050_s2 + $0x8] sm:$0xff]  ;;  %v197_v11 = vld [vmem:[%s1050_s2 + $0x10] sm:$0xff]  ;;  %s470_s5 = sshll.u32 %s187_s4, 4  ;;  %p1064_p11 = scmp.ne.s32.totalorder %s1054_s24, 0  ;;  %s1006_s5 = int_to_ptr.vmem [resolvable:$true] %s470_s5 }
  0x3e   : > { %575 = vmatprep.mubr.msk.f32.mxu0 %vm203_vm0, %v195_v5  ;;  %588 = vmatprep.subr.bf16.mxu0 %v587_v3  ;;  %v199_v7 = vld [vmem:[%s1050_s2 + $0x20] sm:$0xff]  ;;  %v200_v10 = vld [vmem:[%s1050_s2 + $0x28] sm:$0xff]  ;;  %v201_v12 = vld [vmem:[%s1050_s2 + $0x30] sm:$0xff]  ;;  %s706_s13 = scalar_lea.vmem %s1006_s5, 16 }
  0x3f   : > { %595 = vmatprep.subr.bf16.mxu1 %v587_v3  ;;  %590 = vmatpush3.bf16.msra.mxu0 %v587_v3  ;;  %v198_v13 = vld [vmem:[%s1050_s2 + $0x18] sm:$0xff]  ;;  %p707_p6 = scmp.ne.s32.totalorder %s1006_s5, %s706_s13 }
  0x40   : > { %598 = vmatpush3.bf16.msra.mxu1 %v587_v3  ;;  %592 = vmatprep.subr.bf16.mxu0 %v591_v6  ;;  %v202_v14 = vld [vmem:[%s1050_s2 + $0x38] sm:$0xff] }
  0x41   : > { %596 = vmatprep.subr.bf16.mxu1 %v591_v6  ;;  %581 = vmatprep.mubr.msk.f32.mxu1 %vm203_vm0, %v199_v7  ;;  %p708_p12 = pnand %p707_p6, %p1064_p11 }
  0x43   : > { %594 = vmatpush3.bf16.msra.mxu0 %v591_v6  ;;  %p709_p13 = pneg %p708_p12 }
  0x44   : > { %599 = vmatpush3.bf16.msra.mxu1 %v591_v6  ;;  %573 = vmatprep.subr.mxu0 %v194_v8 }
  0x45   : > { %597 = vmatprep.subr.mxu1 %v194_v8 }
  0x47   : > { %574 = vmatpush3.msra.mxu0 %v194_v8 }
  0x48   : > { %600 = vmatpush3.msra.mxu1 %v194_v8  ;;  %576 = vmatmul.mubr.msk.f32.vlgmr.msra.gmra.mrb[0].mxu0 %vm203_vm0, %v196_v9 }
  0x49   : > { %582 = vmatmul.mubr.msk.f32.vlgmr.msra.gmra.mrb[0].mxu1 %vm203_vm0, %v200_v10  ;;  %578 = vmatprep.mubr.msk.f32.mxu0 %vm203_vm0, %v197_v11 }
  0x4a   : > { %584 = vmatprep.mubr.msk.f32.mxu1 %vm203_vm0, %v201_v12 }
  0x4c   : > { %579 = vmatmul.mubr.msk.f32.gmra.mrb[2].mxu0 %vm203_vm0, %v198_v13 }
  0x4d   : > { %585 = vmatmul.mubr.msk.f32.gmra.mrb[2].mxu1 %vm203_vm0, %v202_v14 }
 0x11b   : > { %v949_v15 = vpop.f32.mrb[0].mxu0 }
 0x11c   : > { %v951_v16 = vpop.f32.mrb[0].mxu1  ;;  %v954_v18 = vpop.f32.mrb[1].mxu0 }
 0x11d   : > { %v336_v17 = vand.u32 2147483647, %v951_v16  ;;  %v956_v19 = vpop.f32.mrb[1].mxu1  ;;  %v414_v56 = vmax.f32 %v951_v16, 0.0 }
 0x11e   : > { %v335_v20 = vand.u32 2147483647, %v956_v19  ;;  %v413_v60 = vmax.f32 %v956_v19, 0.0 }
 0x11f   : > { %v342_v21 = vsub.f32 0.0, %v336_v17  ;;  %v959_v23 = vpop.f32.mrb[2].mxu0 }
 0x120   : > { %v341_v22 = vsub.f32 0.0, %v335_v20  ;;  %v961_v24 = vpop.f32.mrb[2].mxu1  ;;  %v334_v26 = vand.u32 2147483647, %v959_v23  ;;  %v965_v29 = vpop.f32.mrb[3].mxu0  ;;  %v412_v2 = vmax.f32 %v959_v23, 0.0 }
 0x121   : > { %v351_v25 = vmul.f32 1.442695, %v342_v21  ;;  %v338_v28 = vand.u32 2147483647, %v961_v24  ;;  %v967_v30 = vpop.f32.mrb[3].mxu1  ;;  %v416_v5 = vmax.f32 %v961_v24, 0.0 }
 0x122   : > { %v349_v27 = vmul.f32 1.442695, %v341_v22  ;;  %v340_v31 = vsub.f32 0.0, %v334_v26  ;;  %v333_v32 = vand.u32 2147483647, %v965_v29  ;;  %v411_v6 = vmax.f32 %v965_v29, 0.0 }
 0x123   : > { %652 = vpow2.f32 %v351_v25  ;;  %v344_v33 = vsub.f32 0.0, %v338_v28  ;;  %v337_v34 = vand.u32 2147483647, %v967_v30  ;;  %v415_v11 = vmax.f32 %v967_v30, 0.0 }
 0x124   : > { %654 = vpow2.f32 %v349_v27  ;;  %v347_v35 = vmul.f32 1.442695, %v340_v31  ;;  %v339_v36 = vsub.f32 0.0, %v333_v32 }
 0x125   : > { %v355_v37 = vmul.f32 1.442695, %v344_v33  ;;  %v343_v38 = vsub.f32 0.0, %v337_v34 }
 0x126   : > { %656 = vpow2.f32 %v347_v35  ;;  %v345_v39 = vmul.f32 1.442695, %v339_v36 }
 0x127   : > { %658 = vpow2.f32 %v355_v37  ;;  %v353_v40 = vmul.f32 1.442695, %v343_v38 }
 0x128   : > { %660 = vpow2.f32 %v345_v39 }
 0x129   : > { %662 = vpow2.f32 %v353_v40 }
 0x12d   : > { %v653_v41 = vpop.eup %652 }
 0x12e   : > { %v655_v42 = vpop.eup %654  ;;  %v384_v43 = vadd.f32 1.0, %v653_v41  ;;  %v387_v52 = vmul.f32 -0.5, %v653_v41  ;;  %v390_v59 = vand.u32 2147483647, %v653_v41 }
 0x12f   : > { %v375_v44 = vadd.f32 1.0, %v655_v42  ;;  %v378_v53 = vmul.f32 -0.5, %v655_v42  ;;  %v381_v0 = vand.u32 2147483647, %v655_v42 }
 0x130   : > { %664 = vlog2.f32 %v384_v43  ;;  %v657_v45 = vpop.eup %656  ;;  %v388_v58 = vadd.f32 1.0, %v387_v52  ;;  %vm977_vm1 = vcmp.lt.f32.partialorder %v390_v59, 0.0004427343  ;;  %v434_v59 = vstv %s433_s10 }
 0x131   : > { %666 = vlog2.f32 %v375_v44  ;;  %v659_v46 = vpop.eup %658  ;;  %v366_v47 = vadd.f32 1.0, %v657_v45  ;;  %v369_v54 = vmul.f32 -0.5, %v657_v45  ;;  %v379_v63 = vadd.f32 1.0, %v378_v53  ;;  %v188_v53 = vld [vmem:[%s906_s11] sm:$0xff] }
 0x132   : > { %v661_v48 = vpop.eup %660  ;;  %v402_v49 = vadd.f32 1.0, %v659_v46  ;;  %v405_v57 = vmul.f32 -0.5, %v659_v46  ;;  %v372_v8 = vand.u32 2147483647, %v657_v45  ;;  %v408_v10 = vand.u32 2147483647, %v659_v46 }
 0x133   : > { %v663_v50 = vpop.eup %662  ;;  %668 = vlog2.f32 %v366_v47  ;;  %v357_v51 = vadd.f32 1.0, %v661_v48  ;;  %v360_v61 = vmul.f32 -0.5, %v661_v48  ;;  %v370_v1 = vadd.f32 1.0, %v369_v54  ;;  %v189_v47 = vld [vmem:[%s906_s11 + $0x8] sm:$0xff]  ;;  %s549_s11 = sshll.u32 %s823_s0, 4  ;;  %s778_s0 = smov [#allocation6]  }
 0x134   : > { %670 = vlog2.f32 %v402_v49  ;;  %v393_v55 = vadd.f32 1.0, %v663_v50  ;;  %v396_v7 = vmul.f32 -0.5, %v663_v50  ;;  %v406_v9 = vadd.f32 1.0, %v405_v57  ;;  %s1004_s8 = scalar_lea.hbm %s1051_s3, %s549_s11  ;;  %s710_s18 = sshll.u32 %s778_s0, 4  ;;  %s711_s18 = int_to_ptr.vmem [resolvable:$false] %s710_s18 }
 0x135   : > { %672 = vlog2.f32 %v357_v51  ;;  %v389_v12 = vmul.f32 %v653_v41, %v388_v58  ;;  %v361_v16 = vadd.f32 1.0, %v360_v61  ;;  %v380_v19 = vmul.f32 %v655_v42, %v379_v63  ;;  %s712_s20 = scalar_lea.vmem %s711_s18, 32  ;;  %p713_p4 = scmp.lt.s32.totalorder %s1006_s5, %s711_s18 }
 0x136   : > { %674 = vlog2.f32 %v393_v55  ;;  %vm981_vm2 = vcmp.lt.f32.partialorder %v381_v0, 0.0004427343  ;;  %v371_v21 = vmul.f32 %v657_v45, %v370_v1  ;;  %v363_v22 = vand.u32 2147483647, %v661_v48  ;;  %p714_p10 = scmp.lt.s32.totalorder %s712_s20, %s706_s13 }
 0x137   : > { %v397_v26 = vadd.f32 1.0, %v396_v7  ;;  %v399_v27 = vand.u32 2147483647, %v663_v50  ;;  %vm373_vm3 = vcmp.lt.f32.partialorder %v372_v8, 0.0004427343  ;;  %v407_v30 = vmul.f32 %v659_v46, %v406_v9 }
 0x138   : > { %vm987_vm4 = vcmp.lt.f32.partialorder %v408_v10, 0.0004427343  ;;  %v362_v35 = vmul.f32 %v661_v48, %v361_v16  ;;  %vm364_vm5 = vcmp.lt.f32.partialorder %v363_v22, 0.0004427343  ;;  %p715_p1 = por %p714_p10, %p713_p4 }
 0x139   : > { %v398_v42 = vmul.f32 %v663_v50, %v397_v26  ;;  %vm400_vm6 = vcmp.lt.f32.partialorder %v399_v27, 0.0004427343 }
 0x13a   : > { %v665_v62 = vpop.eup %664  ;;  %p716_p3 = pnand %p715_p1, %p709_p13 }
 0x13b   : > { %v667_v3 = vpop.eup %666  ;;  %v386_v4 = vmul.f32 0.6931472, %v665_v62 }
 0x13c   : > { %v377_v14 = vmul.f32 0.6931472, %v667_v3 }
 0x13d   : > { %v669_v17 = vpop.eup %668  ;;  %v392_v24 = vsel %vm977_vm1, %v389_v12, %v386_v4 }
 0x13e   : > { %v671_v23 = vpop.eup %670  ;;  %v368_v25 = vmul.f32 0.6931472, %v669_v17  ;;  %v383_v32 = vsel %vm981_vm2, %v380_v19, %v377_v14  ;;  %v420_v37 = vadd.f32 %v414_v56, %v392_v24 }
 0x13f   : > { %v673_v28 = vpop.eup %672  ;;  %v404_v29 = vmul.f32 0.6931472, %v671_v23  ;;  %v419_v43 = vadd.f32 %v413_v60, %v383_v32 }
 0x140   : > { %v374_v33 = vsel %vm373_vm3, %v371_v21, %v368_v25  ;;  %v359_v34 = vmul.f32 0.6931472, %v673_v28  ;;  %v675_v36 = vpop.eup %674 }
 0x141   : > { %v418_v38 = vadd.f32 %v412_v2, %v374_v33  ;;  %v410_v39 = vsel %vm987_vm4, %v407_v30, %v404_v29  ;;  %v395_v41 = vmul.f32 0.6931472, %v675_v36 }
 0x142   : > { %v365_v40 = vsel %vm364_vm5, %v362_v35, %v359_v34  ;;  %v422_v45 = vadd.f32 %v416_v5, %v410_v39 }
 0x143   : > { %v424_v44 = vadd.f32 %v420_v37, %v418_v38  ;;  %v417_v46 = vadd.f32 %v411_v6, %v365_v40  ;;  %v401_v49 = vsel %vm400_vm6, %v398_v42, %v395_v41 }
 0x144   : > { %v421_v52 = vadd.f32 %v415_v11, %v401_v49 }
 0x145   : > { %v426_v51 = vadd.f32 %v424_v44, %v422_v45  ;;  %v423_v48 = vadd.f32 %v419_v43, %v417_v46 }
 0x147   : > { %v428_v54 = vmul.f32 %v426_v51, %v189_v47  ;;  %v425_v55 = vadd.f32 %v423_v48, %v421_v52 }
 0x149   : > { %v430_v56 = vadd.f32 %v949_v15, %v428_v54  ;;  %v427_v57 = vmul.f32 %v425_v55, %v188_v53 }
 0x14b   : > { %v429_v58 = vadd.f32 %v427_v57, %v954_v18 }
 0x14d   : > { %v431_v50 = vadd.f32 %v430_v56, %v429_v58 }
 0x14f   : > { %v432_v60 = vmul.f32 0.16666667, %v431_v50 }
 0x151   : > { %v435_v61 = vsub.f32 %v432_v60, %v434_v59 }
 0x153   : > { %v436_v62 = vmax.f32 %v435_v61, 0.0 }
 0x155   : > { %v438_v63 = vsel %vm437_vm7, %v436_v62, -inf  ;;  %v447_v0 = vsel %vm446_vm8, %v436_v62, -inf }
 0x156   : > { %v439_v1 = vrot.slane %v438_v63, 4  ;;  %v448_v2 = vrot.slane %v447_v0, 4 }
 0x158   : > { %v440_v3 = vmax.f32 %v438_v63, %v439_v1  ;;  %v449_v4 = vmax.f32 %v447_v0, %v448_v2 }
 0x15a   : > { %v441_v5 = vrot.slane %v440_v3, 2  ;;  %v450_v15 = vrot.slane %v449_v4, 2 }
 0x15c   : > { %v442_v6 = vmax.f32 %v440_v3, %v441_v5  ;;  %v451_v18 = vmax.f32 %v449_v4, %v450_v15 }
 0x15e   : > { %v443_v7 = vrot.slane %v442_v6, 1  ;;  %v452_v8 = vrot.slane %v451_v18, 1 }
 0x160   : > { %v444_v9 = vmax.f32 %v442_v6, %v443_v7  ;;  %v453_v10 = vmax.f32 %v451_v18, %v452_v8 }
 0x162   : > { %v454_v11 = vadd.f32 %v453_v10, %v444_v9 }
 0x164   : > { %v455_v12 = vmul.f32 0.5, %v454_v11 }
 0x166   : > { %456 = vst [vmem:[%s187_s4] sm:$0x1] %v455_v12 }
 0x167   : > { %719 = shalt.err (!%p716_p3)
}
 0x168   : > { %s720_s6 = scalar_lea.hbm %s1004_s8, 16  ;;  %s724_s27 = scalar_lea.hbm %s1051_s3, 32 }
 0x169   : > { %p721_p5 = scmp.ne.s32.totalorder %s1004_s8, %s720_s6  ;;  %p725_p9 = scmp.lt.u32.totalorder %s1004_s8, %s1051_s3 }
 0x16a   : > { %p726_p0 = scmp.lt.u32.totalorder %s724_s27, %s720_s6  ;;  %p728_p6 = scmp.lt.u32.totalorder %s720_s6, %s1004_s8 }
 0x16b   : > { %p722_p7 = pnand %p721_p5, %p1064_p11 }
 0x16c   : > { %p727_p2 = por %p726_p0, %p725_p9 }
 0x16d   : > { %p723_p8 = pneg %p722_p7 }
 0x16e   : > { %p729_p12 = por %p728_p6, %p727_p2 }
 0x170   : > { %p730_p13 = pnand %p729_p12, %p723_p8 }
 0x172   : > { %733 = shalt.err (!%p730_p13)
}
 0x173   : > { %605 = dma.vmem_to_hbm [thread:$0]  (%p1064_p11), %s1006_s5, 16, %s1004_s8, %s458_s12  }
 0x174 PF: > { %s482_s30 = sand.u32 1, %s760_s14   ;;  %p1065_p4 = scmp.ne.s32.totalorder %s1055_s25, 0 }
 0x175   : > { %p1066_p10 = scmp.ge.s32.totalorder %s772_s17, 2  ;;  %s483_s9 = scalar_lea.sflag [#allocation5], %s482_s30 }
 0x177   : > { %p612_p1 = pnand %p1066_p10, %p1065_p4 }
 0x179   : > { %755 = dma.done.wait (!%p612_p1), %s483_s9, 16  }
 0x17a   : > { %757 = vsyncadd (!%p612_p1), %s483_s9, 4294967280  ;;  %p17_p3 = scmp.ge.s32.totalorder %s827_s19, 4   ;;  %s1067_s14 = smov %s764_s15 }
 0x17b   : > { %s1068_s15 = smov %s768_s16  ;;  %s1069_s16 = smov %s839_s22 }
 0x17c   : > { %s1070_s17 = smov %s827_s19  ;;  %19 = sbr.rel (!%p17_p3) target bundleno = 7 (0x7), region = 77 }
 0x183   :  { %487 = vsyncpa [#allocation4], 1 }
 0x184   :  { %489 = vsyncpa [#allocation4 + $0x1], 1 }
 0x185   :  { %490 = vsyncpa [#allocation5], 1 }
 0x186   :  { %492 = vsyncpa [#allocation5 + $0x1], 1 }

</bundles_post_ra>
